<compile_context>
chip_gen: v5e
topology: v5e:2x2
jax: 0.10.0
libtpu: 0.0.40
codegen_flags: <defaults>
</compile_context>

<pallas_src>
import jax
import jax.numpy as jnp
from jax.experimental import pallas as pl
from jax.experimental.pallas import tpu as pltpu  # noqa: F401  (TPU backend)


def _linear_model_kernel(x_ref, w_ref, b_ref, o_ref):
    x = x_ref[...]          # (B, in)        f32
    w = w_ref[...]          # (in, out)      f32, pre-transposed at init time
    b = b_ref[...]          # (1, out)       f32

    # Raw matmul first (MXU, NN orientation, f32 accumulation).
    acc = jnp.dot(x, w, preferred_element_type=jnp.float32)   # (B, out)

    # Global L2 norm of x; apply the scale in the epilogue — it commutes
    # through the matmul, so we scale B*out elements instead of B*in.
    ss = jnp.sum(x * x)                          # XLU cross-lane reduce
    inv = jax.lax.rsqrt(ss + 1e-32)              # one EUP op; finite for x==0

    o_ref[...] = (acc * inv + b).astype(o_ref.dtype)          # .float() -> f32


def prepare_linear_params(weight, bias):
    """One-time parameter prep (hoisted out of the per-call forward path).

    weight: (out, in) f32, bias: (out,) f32
    -> w_t: (in, out) f32, b_row: (1, out) f32
    """
    w_t = jnp.asarray(weight, jnp.float32).T       # (in, out)
    b_row = jnp.asarray(bias, jnp.float32).reshape(1, -1)
    return w_t, b_row


def linear_model_forward(x, w_t, b_row):
    """x: (B, in) f32; w_t: (in, out) f32; b_row: (1, out) f32 -> (B, out) f32."""
    B, in_f = x.shape
    out_f = w_t.shape[1]

    return pl.pallas_call(
        _linear_model_kernel,
        out_shape=jax.ShapeDtypeStruct((B, out_f), jnp.float32),
        in_specs=[
            pl.BlockSpec((B, in_f), lambda: (0, 0)),
            pl.BlockSpec((in_f, out_f), lambda: (0, 0)),
            pl.BlockSpec((1, out_f), lambda: (0, 0)),
        ],
        out_specs=pl.BlockSpec((B, out_f), lambda: (0, 0)),
    )(x, w_t, b_row)


def init_linear_params(key, in_features, out_features):
    """Deterministic init mimicking torch.nn.Linear (uniform +-1/sqrt(in_features))."""
    kw, kb = jax.random.split(key)
    bound = 1.0 / jnp.sqrt(jnp.float32(in_features))
    weight = jax.random.uniform(kw, (out_features, in_features), jnp.float32,
                                minval=-bound, maxval=bound)
    bias = jax.random.uniform(kb, (out_features,), jnp.float32,
                              minval=-bound, maxval=bound)
    return weight, bias


if __name__ == "__main__":
    key = jax.random.PRNGKey(0)
    k_x, k_p = jax.random.split(key)

    batch = 8
    in_features = 32
    out_features = 16

    x = jax.random.normal(k_x, (batch, in_features), dtype=jnp.float32)
    weight, bias = init_linear_params(k_p, in_features, out_features)

    # Parameter prep happens once, outside the per-call forward path.
    w_t, b_row = prepare_linear_params(weight, bias)
    w_t, b_row = jax.block_until_ready((w_t, b_row))

    out = linear_model_forward(x, w_t, b_row)
    out = jax.block_until_ready(out)

    # Sanity check against pure-JAX reference (original torch semantics).
    ref = (x / (jnp.linalg.norm(x) + 1e-16)) @ weight.T + bias
    assert out.shape == (batch, out_features)
    assert out.dtype == jnp.float32
    assert jnp.allclose(out, ref, atol=1e-5, rtol=1e-5)

    print("KERNEL_OK")
</pallas_src>

<mosaic_0001>
module attributes {stable_mosaic.version = 11 : i64} {
  func.func @_linear_model_kernel(%arg0: memref<8x32xf32, #tpu.memory_space<vmem>>, %arg1: memref<32x16xf32, #tpu.memory_space<vmem>>, %arg2: memref<1x16xf32, #tpu.memory_space<vmem>>, %arg3: memref<8x16xf32, #tpu.memory_space<vmem>>) attributes {dimension_semantics = [], scalar_prefetch = 0 : i64, scratch_operands = 0 : i64, tpu.core_type = #tpu.core_type<tc>} {
    %c0 = arith.constant 0 : index
    %c0_0 = arith.constant 0 : index
    %0 = vector.load %arg0[%c0, %c0_0] : memref<8x32xf32, #tpu.memory_space<vmem>>, vector<8x32xf32>
    %c0_1 = arith.constant 0 : index
    %c0_2 = arith.constant 0 : index
    %1 = vector.load %arg1[%c0_1, %c0_2] : memref<32x16xf32, #tpu.memory_space<vmem>>, vector<32x16xf32>
    %c0_3 = arith.constant 0 : index
    %c0_4 = arith.constant 0 : index
    %2 = vector.load %arg2[%c0_3, %c0_4] : memref<1x16xf32, #tpu.memory_space<vmem>>, vector<1x16xf32>
    %cst = arith.constant dense<0.000000e+00> : vector<8x16xf32>
    %3 = tpu.matmul %0, %1, %cst {dimension_numbers = #tpu.dot_dimension_numbers<[1], [0], [0], [1], [0, 0, 1, 1], [], []>} : vector<8x32xf32>, vector<32x16xf32>, vector<8x16xf32> -> vector<8x16xf32>
    %4 = arith.mulf %0, %0 : vector<8x32xf32>
    %5 = vector.shape_cast %4 : vector<8x32xf32> to vector<1x8x32xf32>
    %cst_5 = arith.constant dense<0.000000e+00> : vector<1xf32>
    %6 = vector.multi_reduction <add>, %5, %cst_5 [1, 2] : vector<1x8x32xf32> to vector<1xf32>
    %7 = vector.shape_cast %6 : vector<1xf32> to vector<1x1x1xf32>
    %8 = vector.extract %7[0, 0, 0] : f32 from vector<1x1x1xf32>
    %cst_6 = arith.constant 1.000000e-32 : f32
    %9 = arith.addf %8, %cst_6 : f32
    %10 = math.rsqrt %9 : f32
    %11 = vector.broadcast %10 : f32 to vector<8x16xf32>
    %12 = arith.mulf %3, %11 : vector<8x16xf32>
    %13 = vector.broadcast %2 : vector<1x16xf32> to vector<8x16xf32>
    %14 = arith.addf %12, %13 : vector<8x16xf32>
    %c0_7 = arith.constant 0 : index
    %c0_8 = arith.constant 0 : index
    %15 = vector.load %arg3[%c0_7, %c0_8] : memref<8x16xf32, #tpu.memory_space<vmem>>, vector<8x16xf32>
    tpu.vector_store %arg3[%c0_7, %c0_8], %14 {strides = array<i32>} : memref<8x16xf32, #tpu.memory_space<vmem>>, vector<8x16xf32>,
    return
  }
}

</mosaic_0001>

<bundles_post_ra>
// kernel: tpu_custom_call.1
= control target key start
LH: loop header
LB: loop body
LE: loop exit
PB: predicated region body
PF: predicated region fallthrough
CT: control target
= control target key end

     0   :  { %vm21_vm0 = vcmask 261120   ;;  %s170_s0 = inlined_call_operand.vmem [shape: f32[8,32], index: 0, kind: input, shape index: {}]   ;;  %s171_s1 = inlined_call_operand.vmem [shape: f32[32,16], index: 1, kind: input, shape index: {}]   ;;  %s172_s2 = inlined_call_operand.vmem [shape: f32[1,16], index: 2, kind: input, shape index: {}]   ;;  %s173_s3 = inlined_call_operand.hbm [shape: f32[8,16], index: 3, kind: output, shape index: {}]  }
   0x1   :  { %v15_v0 = vld [vmem:[%s170_s0] sm:$0xff] }
   0x2   :  { %8 = vsyncpa [#allocation3], 0  ;;  %v45_v1 = vmul.f32 %v15_v0, %v15_v0  ;;  %v19_v3 = vld [vmem:[%s171_s1 + $0x18] sm:$0xff]  ;;  %v18_v4 = vld [vmem:[%s171_s1 + $0x10] sm:$0xff]  ;;  %s128_s25 = smov [#allocation2]   ;;  %s84_s29 = sshll.u32 %s173_s3, 4  ;;  %s85_s29 = int_to_ptr.hbm [resolvable:$true] %s84_s29 }
   0x3   :  { %37 = vmatpush.msra.mxu0 %v19_v3  ;;  %v17_v5 = vld [vmem:[%s171_s1 + $0x8] sm:$0xff]  ;;  %v16_v6 = vld [vmem:[%s171_s1] sm:$0xff]  ;;  %s82_s26 = sshll.u32 %s128_s25, 4  ;;  %vm75_vm4 = vcmask 130048   ;;  %s83_s26 = int_to_ptr.vmem [resolvable:$true] %s82_s26 }
   0x4   :  { %v46_v2 = vsel %vm21_vm0, %v45_v1, 0.0  ;;  %v99_v23 = vld [vmem:[%s172_s2] ss:$0 sm:$0xff] }
   0x5   :  { %47 = vadd.xlane.f32.xlu0 %v46_v2  ;;  %38 = vmatpush.msra.mxu0 %v18_v4 }
   0x7   :  { %39 = vmatpush.msra.mxu0 %v17_v5 }
   0x9   :  { %40 = vmatpush.msra.mxu0 %v16_v6 }
   0xa   :  { %93 = vmatmul.msk.f32.vlgmr.msra.gmra.mxu0 %vm21_vm0, %v15_v0 }
  0x78   :  { %v48_v7 = vpop.xlane.xlu0 %47 }
  0x79   :  { %v49_v8 = vrot.slane %v48_v7, 4 }
  0x7b   :  { %v50_v9 = vadd.f32 %v49_v8, %v48_v7 }
  0x7d   :  { %v51_v10 = vrot.slane %v50_v9, 2 }
  0x7f   :  { %v52_v11 = vadd.f32 %v51_v10, %v50_v9 }
  0x81   :  { %v53_v12 = vrot.slane %v52_v11, 1 }
  0x83   :  { %v54_v13 = vadd.f32 %v53_v12, %v52_v11 }
  0x85   :  { %94 = vpush %v54_v13 }
  0x87   :  { %v42_v22 = vpop.f32.mrf.mxu0 }
  0xb6   :  { %s95_s21 = spop %94 }
  0xb7   :  { %s56_s22 = sadd.f32 1e-32, %s95_s21 }
  0xb9   :  { %v57_v14 = vstv %s56_s22 }
  0xba   :  { %100 = vrsqrt.f32 %v57_v14  ;;  %vm64_vm2 = vweird.f32 %v57_v14 }
  0xc0   :  { %v101_v15 = vpop.eup %100 }
  0xc1   :  { %v59_v16 = vmul.f32 %v101_v15, %v57_v14  ;;  %vm65_vm1 = vweird.f32 %v101_v15 }
  0xc2   :  { %vm66_vm3 = vmor %vm64_vm2, %vm65_vm1 }
  0xc3   :  { %v60_v17 = vmul.f32 %v101_v15, %v59_v16 }
  0xc5   :  { %v61_v18 = vmul.f32 0.5, %v60_v17 }
  0xc7   :  { %v62_v19 = vsub.f32 1.5, %v61_v18 }
  0xc9   :  { %v63_v20 = vmul.f32 %v101_v15, %v62_v19 }
  0xcb   :  { %v67_v21 = vsel %vm66_vm3, %v101_v15, %v63_v20 }
  0xcc   :  { %96 = vpush %v67_v21 }
  0xfd   :  { %s97_s1 = spop %96 }
  0xfe   :  { %v69_v24 = vstv %s97_s1 }
  0xff   :  { %v70_v25 = vmul.f32 %v69_v24, %v42_v22 }
 0x101   :  { %v74_v26 = vadd.f32 %v99_v23, %v70_v25 }
 0x103   :  { %76 = vst.msk [vmem:[#allocation2] sm:$0xff] %vm75_vm4, %v74_v26 }
 0x104   :  { %87 = dma.vmem_to_hbm [thread:$0]  %s83_s26, 128, %s85_s29, [#allocation3]  }
 0x105   :  { %126 = dma.done.wait [#allocation3], 128  }
 0x106   :  { %127 = vsyncadd [#allocation3], 4294967168 }
 0x107   :  { %92 = vsyncpa [#allocation3], 1 }

</bundles_post_ra>
